<compile_context>
chip_gen: v5e
topology: v5e:2x2
jax: 0.10.0
libtpu: 0.0.40
codegen_flags: <defaults>
</compile_context>

<pallas_src>
import jax
import jax.numpy as jnp
import numpy as np
from jax.experimental import pallas as pl
from jax.experimental.pallas import tpu as pltpu


def _calayer_kernel(x_ref, wp_ref, o_ref):
    # x_ref : (Nb, C, HW)   Nb batch elements; channels on sublanes, pixels on lanes
    # wp_ref: (C, 3*Cr+1)   packed [w1 | w2 | b1(bcast over C) | b2]
    # o_ref : (Nb, C, HW)
    _, _, HW = x_ref.shape
    Cr = (wp_ref.shape[1] - 1) // 3

    x = x_ref[...].astype(jnp.float32)                         # (Nb, C, HW)
    wp = wp_ref[...]                                            # (C, 3*Cr+1) f32
    w1 = wp[:, 0:Cr]                                            # (C, Cr)
    w2 = wp[:, Cr:2 * Cr]                                       # (C, Cr)
    b1 = wp[0:1, 2 * Cr:3 * Cr]                                 # (1, Cr)
    b2 = wp[:, 3 * Cr:3 * Cr + 1]                               # (C, 1)

    # Global average pool over the spatial (lane) axis.
    pooled = jnp.sum(x, axis=-1, keepdims=True) * (1.0 / HW)    # (Nb, C, 1)

    # Squeeze: z[n, r] = relu(sum_c pooled[n, c] * w1[c, r] + b1[r])
    # VPU broadcast-multiply + sublane (XLU) reduce — no MXU for ~C*Cr MACs.
    z = jnp.maximum(
        jnp.sum(pooled * w1[None], axis=1, keepdims=True) + b1[None],
        0.0)                                                    # (Nb, 1, Cr)

    # Excite: s[n, c] = sigmoid(sum_r z[n, r] * w2[c, r] + b2[c])  (EUP sigmoid)
    s = jax.nn.sigmoid(
        jnp.sum(z * w2[None], axis=-1, keepdims=True) + b2[None])  # (Nb, C, 1)

    # Channel-wise scaling broadcast across the lane (pixel) axis; lane-dense store.
    o_ref[...] = (x * s).astype(o_ref.dtype)


@jax.jit
def calayer_forward(x_nchw, params):
    """CALayer forward. x_nchw: (N, C, H, W); returns (N, C, H, W)."""
    N, C, H, W = x_nchw.shape
    HW = H * W
    Cr = params["w1"].shape[1]
    x = x_nchw.reshape(N, C, HW)          # contiguous reshape: no data movement

    # Pack the four tiny parameter tensors into one (C, 3*Cr+1) block: 1 DMA.
    wp = jnp.concatenate(
        [
            params["w1"].astype(jnp.float32),                               # (C, Cr)
            params["w2"].astype(jnp.float32),                               # (C, Cr)
            jnp.broadcast_to(params["b1"].astype(jnp.float32).reshape(1, Cr),
                             (C, Cr)),                                      # (C, Cr)
            params["b2"].astype(jnp.float32).reshape(C, 1),                 # (C, 1)
        ],
        axis=1)                                                             # (C, 3*Cr+1)

    # Batch-block size: fewer, fatter DMAs. Target ~1 MiB per block; for the
    # toy N=2 case this takes the whole batch in a single grid step.
    itemsize = x_nchw.dtype.itemsize
    per_elem_bytes = C * HW * itemsize
    nb_cap = max(1, (1 << 20) // per_elem_bytes)
    Nb = 1
    for d in range(min(N, nb_cap), 0, -1):
        if N % d == 0:
            Nb = d
            break
    grid = (N // Nb,)

    # Right-sized VMEM budget: double-buffered in + out blocks + packed
    # weights + headroom (floor 2 MiB). Never ask for all of v7x's 64 MiB.
    block_bytes = Nb * per_elem_bytes
    vmem_limit = int(max(4 * block_bytes + (1 << 20), 2 << 20))

    out = pl.pallas_call(
        _calayer_kernel,
        out_shape=jax.ShapeDtypeStruct((N, C, HW), x_nchw.dtype),
        grid=grid,
        in_specs=[
            pl.BlockSpec((Nb, C, HW), lambda n: (n, 0, 0)),
            pl.BlockSpec((C, 3 * Cr + 1), lambda n: (0, 0)),
        ],
        out_specs=pl.BlockSpec((Nb, C, HW), lambda n: (n, 0, 0)),
        compiler_params=pltpu.CompilerParams(
            dimension_semantics=("parallel",),
            vmem_limit_bytes=vmem_limit),
    )(x, wp)

    return out.reshape(N, C, H, W)


def calayer_reference(x_nchw, params):
    """Pure-JAX reference (same math as the PyTorch CALayer module)."""
    x = x_nchw.astype(jnp.float32)
    y = jnp.mean(x, axis=(2, 3))                                       # (N, C)
    z = jnp.maximum(y @ params["w1"] + params["b1"], 0.0)              # (N, Cr)
    s = jax.nn.sigmoid(z @ params["w2"].T + params["b2"][:, 0])        # (N, C)
    return (x * s[:, :, None, None]).astype(x_nchw.dtype)


def make_params(key, channel, reduction=16):
    c = channel
    cr = max(channel // reduction, 1)
    ks = jax.random.split(key, 4)
    scale = 0.3
    return {
        "w1": jax.random.normal(ks[0], (c, cr), jnp.float32) * scale,
        "b1": jax.random.normal(ks[1], (1, cr), jnp.float32) * scale,
        "w2": jax.random.normal(ks[2], (c, cr), jnp.float32) * scale,
        "b2": jax.random.normal(ks[3], (c, 1), jnp.float32) * scale,
    }


if __name__ == "__main__":
    key = jax.random.PRNGKey(0)
    kp, kx = jax.random.split(key)

    # channel=32, reduction=16 -> squeeze width 2 (matches the module defaults)
    N, C, H, W = 2, 32, 16, 16
    params = make_params(kp, channel=C, reduction=16)
    x = jax.random.normal(kx, (N, C, H, W), jnp.float32)

    out = calayer_forward(x, params)
    out = jax.block_until_ready(out)

    ref = calayer_reference(x, params)
    np.testing.assert_allclose(np.asarray(out), np.asarray(ref),
                               rtol=1e-3, atol=1e-3)
    assert out.shape == x.shape and out.dtype == x.dtype
    print("KERNEL_OK")
</pallas_src>

<mosaic_0001>
module attributes {stable_mosaic.version = 11 : i64} {
  func.func @_calayer_kernel(%arg0: i32, %arg1: memref<2x32x256xf32, #tpu.memory_space<vmem>>, %arg2: memref<32x7xf32, #tpu.memory_space<vmem>>, %arg3: memref<2x32x256xf32, #tpu.memory_space<vmem>>) attributes {dimension_semantics = [#tpu.dimension_semantics<parallel>], iteration_bounds = array<i64: 1>, scalar_prefetch = 0 : i64, scratch_operands = 0 : i64, tpu.core_type = #tpu.core_type<tc>, window_params = [{transform_indices = @transform_0, window_bounds = array<i64: 2, 32, 256>}, {pipeline_mode = #tpu.pipeline_mode<synchronous>, transform_indices = @transform_1, window_bounds = array<i64: 32, 7>}, {transform_indices = @transform_2, window_bounds = array<i64: 2, 32, 256>}]} {
    %c0 = arith.constant 0 : index
    %c0_0 = arith.constant 0 : index
    %c0_1 = arith.constant 0 : index
    %0 = vector.load %arg1[%c0, %c0_0, %c0_1] : memref<2x32x256xf32, #tpu.memory_space<vmem>>, vector<2x32x256xf32>
    %c0_2 = arith.constant 0 : index
    %c0_3 = arith.constant 0 : index
    %1 = vector.load %arg2[%c0_2, %c0_3] : memref<32x7xf32, #tpu.memory_space<vmem>>, vector<32x7xf32>
    %2 = vector.extract_strided_slice %1 {offsets = [0, 0], sizes = [32, 2], strides = [1, 1]} : vector<32x7xf32> to vector<32x2xf32>
    %3 = vector.extract_strided_slice %1 {offsets = [0, 2], sizes = [32, 2], strides = [1, 1]} : vector<32x7xf32> to vector<32x2xf32>
    %4 = vector.extract_strided_slice %1 {offsets = [0, 4], sizes = [1, 2], strides = [1, 1]} : vector<32x7xf32> to vector<1x2xf32>
    %5 = vector.extract_strided_slice %1 {offsets = [0, 6], sizes = [32, 1], strides = [1, 1]} : vector<32x7xf32> to vector<32x1xf32>
    %cst = arith.constant dense<0.000000e+00> : vector<2x32xf32>
    %6 = vector.multi_reduction <add>, %0, %cst [2] : vector<2x32x256xf32> to vector<2x32xf32>
    %7 = vector.shape_cast %6 : vector<2x32xf32> to vector<2x32x1xf32>
    %cst_4 = arith.constant 3.906250e-03 : f32
    %8 = vector.broadcast %cst_4 : f32 to vector<2x32x1xf32>
    %9 = arith.mulf %7, %8 : vector<2x32x1xf32>
    %10 = vector.shape_cast %2 : vector<32x2xf32> to vector<1x32x2xf32>
    %11 = vector.broadcast %9 : vector<2x32x1xf32> to vector<2x32x2xf32>
    %12 = vector.broadcast %10 : vector<1x32x2xf32> to vector<2x32x2xf32>
    %13 = arith.mulf %11, %12 : vector<2x32x2xf32>
    %cst_5 = arith.constant dense<0.000000e+00> : vector<2x2xf32>
    %14 = vector.multi_reduction <add>, %13, %cst_5 [1] : vector<2x32x2xf32> to vector<2x2xf32>
    %15 = vector.shape_cast %14 : vector<2x2xf32> to vector<2x1x2xf32>
    %16 = vector.shape_cast %4 : vector<1x2xf32> to vector<1x1x2xf32>
    %17 = vector.broadcast %16 : vector<1x1x2xf32> to vector<2x1x2xf32>
    %18 = arith.addf %15, %17 : vector<2x1x2xf32>
    %cst_6 = arith.constant 0.000000e+00 : f32
    %19 = vector.broadcast %cst_6 : f32 to vector<2x1x2xf32>
    %20 = arith.maximumf %18, %19 : vector<2x1x2xf32>
    %21 = vector.shape_cast %3 : vector<32x2xf32> to vector<1x32x2xf32>
    %22 = vector.broadcast %20 : vector<2x1x2xf32> to vector<2x32x2xf32>
    %23 = vector.broadcast %21 : vector<1x32x2xf32> to vector<2x32x2xf32>
    %24 = arith.mulf %22, %23 : vector<2x32x2xf32>
    %cst_7 = arith.constant dense<0.000000e+00> : vector<2x32xf32>
    %25 = vector.multi_reduction <add>, %24, %cst_7 [2] : vector<2x32x2xf32> to vector<2x32xf32>
    %26 = vector.shape_cast %25 : vector<2x32xf32> to vector<2x32x1xf32>
    %27 = vector.shape_cast %5 : vector<32x1xf32> to vector<1x32x1xf32>
    %28 = vector.broadcast %27 : vector<1x32x1xf32> to vector<2x32x1xf32>
    %29 = arith.addf %26, %28 : vector<2x32x1xf32>
    %30 = arith.negf %29 : vector<2x32x1xf32>
    %31 = math.exp %30 : vector<2x32x1xf32>
    %cst_8 = arith.constant 1.000000e+00 : f32
    %32 = vector.broadcast %cst_8 : f32 to vector<2x32x1xf32>
    %33 = arith.addf %32, %31 : vector<2x32x1xf32>
    %34 = arith.divf %32, %33 : vector<2x32x1xf32>
    %35 = vector.broadcast %34 : vector<2x32x1xf32> to vector<2x32x256xf32>
    %36 = arith.mulf %0, %35 : vector<2x32x256xf32>
    %c0_9 = arith.constant 0 : index
    %c0_10 = arith.constant 0 : index
    %c0_11 = arith.constant 0 : index
    %37 = vector.load %arg3[%c0_9, %c0_10, %c0_11] : memref<2x32x256xf32, #tpu.memory_space<vmem>>, vector<2x32x256xf32>
    tpu.vector_store %arg3[%c0_9, %c0_10, %c0_11], %36 {strides = array<i32>} : memref<2x32x256xf32, #tpu.memory_space<vmem>>, vector<2x32x256xf32>,
    return
  }
  func.func @transform_0(%arg0: i32) -> (i32, i32, i32) {
    %c0_i32 = arith.constant 0 : i32
    %c0_i32_0 = arith.constant 0 : i32
    %c0_i32_1 = arith.constant 0 : i32
    return %arg0, %c0_i32, %c0_i32_0 : i32, i32, i32
  }
  func.func @transform_1(%arg0: i32) -> (i32, i32) {
    %c0_i32 = arith.constant 0 : i32
    %c0_i32_0 = arith.constant 0 : i32
    %c0_i32_1 = arith.constant 0 : i32
    return %c0_i32, %c0_i32_0 : i32, i32
  }
  func.func @transform_2(%arg0: i32) -> (i32, i32, i32) {
    %c0_i32 = arith.constant 0 : i32
    %c0_i32_0 = arith.constant 0 : i32
    %c0_i32_1 = arith.constant 0 : i32
    return %arg0, %c0_i32, %c0_i32_0 : i32, i32, i32
  }
}

</mosaic_0001>

<bundles_post_ra>
// kernel: calayer_forward.1
= control target key start
LH: loop header
LB: loop body
LE: loop exit
PB: predicated region body
PF: predicated region fallthrough
CT: control target
= control target key end

     0   :  { %s437_s15 = smov 124   ;;  %s438_s16 = smov 126   ;;  %vm71_vm0 = vcmask 15360   ;;  %s747_s0 = inlined_call_operand.vmem [shape: f32[2,32,256], index: 0, kind: input, shape index: {}]   ;;  %s748_s1 = inlined_call_operand.vmem [shape: f32[32,7], index: 1, kind: input, shape index: {}]   ;;  %s749_s2 = inlined_call_operand.vmem [shape: f32[2,32,256], index: 2, kind: output, shape index: {}]  }
   0x1   :  { %v458_v0 = vld [vmem:[%s747_s0 + $0x40] sm:$0xff]  ;;  %v463_v1 = vld [vmem:[%s747_s0 + $0x48] sm:$0xff]  ;;  %v494_v9 = vld [vmem:[%s747_s0 + $0x50] sm:$0xff] }
   0x2   :  { %v468_v2 = vld [vmem:[%s747_s0] sm:$0xff]  ;;  %v43_v3 = vadd.f32 %v463_v1, %v458_v0  ;;  %v475_v4 = vld [vmem:[%s747_s0 + $0x8] sm:$0xff]  ;;  %v499_v10 = vld [vmem:[%s747_s0 + $0x58] sm:$0xff] }
   0x3   :  { %v480_v5 = vld [vmem:[%s747_s0 + $0x20] sm:$0xff]  ;;  %v485_v6 = vld [vmem:[%s747_s0 + $0x28] sm:$0xff]  ;;  %v31_v7 = vadd.f32 %v475_v4, %v468_v2  ;;  %v504_v11 = vld [vmem:[%s747_s0 + $0x10] sm:$0xff]  ;;  %v46_v15 = vadd.f32 %v499_v10, %v494_v9 }
   0x4   :  { %v37_v8 = vadd.f32 %v485_v6, %v480_v5  ;;  %44 = vadd.xlane.f32.xlu1 %v43_v3  ;;  %v509_v12 = vld [vmem:[%s747_s0 + $0x18] sm:$0xff]  ;;  %v514_v13 = vld [vmem:[%s747_s0 + $0x60] sm:$0xff]  ;;  %v519_v14 = vld [vmem:[%s747_s0 + $0x68] sm:$0xff] }
   0x5   :  { %32 = vadd.xlane.f32.xlu0 %v31_v7  ;;  %v34_v16 = vadd.f32 %v509_v12, %v504_v11  ;;  %v49_v17 = vadd.f32 %v519_v14, %v514_v13  ;;  %v530_v18 = vld [vmem:[%s747_s0 + $0x70] sm:$0xff]  ;;  %v535_v19 = vld [vmem:[%s747_s0 + $0x78] sm:$0xff]  ;;  %v554_v24 = vld [vmem:[%s748_s1] sm:$0xff] }
   0x6   :  { %38 = vadd.xlane.f32.xlu2 %v37_v8  ;;  %v540_v20 = vld [vmem:[%s747_s0 + $0x30] sm:$0xff]  ;;  %v545_v21 = vld [vmem:[%s747_s0 + $0x38] sm:$0xff]  ;;  %v52_v22 = vadd.f32 %v535_v19, %v530_v18  ;;  %v561_v25 = vld [vmem:[%s748_s1 + $0x8] sm:$0xff] }
   0x7   :  { %v40_v23 = vadd.f32 %v545_v21, %v540_v20  ;;  %v566_v26 = vld [vmem:[%s748_s1 + $0x10] sm:$0xff]  ;;  %v573_v27 = vld [vmem:[%s748_s1 + $0x18] sm:$0xff] }
   0xc   :  { %47 = vadd.xlane.f32.xlu1 %v46_v15 }
   0xd   :  { %35 = vadd.xlane.f32.xlu0 %v34_v16 }
   0xe   :  { %50 = vadd.xlane.f32.xlu2 %v49_v17 }
  0x14   :  { %53 = vadd.xlane.f32.xlu1 %v52_v22 }
  0x15   :  { %41 = vadd.xlane.f32.xlu0 %v40_v23 }
  0x26   :  { %99 = vrot.lane.b32.xlu2 %v554_v24, %s437_s15 }
  0x29   :  { %111 = vrot.lane.b32.xlu0 %v554_v24, %s438_s16 }
  0x2d   :  { %113 = vrot.lane.b32.xlu1 %v561_v25, %s438_s16 }
  0x2e   :  { %115 = vrot.lane.b32.xlu2 %v566_v26, %s438_s16 }
  0x31   :  { %117 = vrot.lane.b32.xlu0 %v573_v27, %s438_s16 }
  0x77   :  { %v45_v28 = vpop.xlane.xlu1 %44 }
  0x78   :  { %v33_v29 = vpop.xlane.xlu0 %32  ;;  %v59_v31 = vmul.f32 0.00390625, %v45_v28 }
  0x79   :  { %v39_v30 = vpop.xlane.xlu2 %38  ;;  %v55_v32 = vmul.f32 0.00390625, %v33_v29 }
  0x7a   :  { %v57_v37 = vmul.f32 0.00390625, %v39_v30  ;;  %v67_v40 = vmul.f32 %v59_v31, %v554_v24 }
  0x7b   :  { %v63_v42 = vmul.f32 %v55_v32, %v554_v24 }
  0x7c   :  { %v65_v46 = vmul.f32 %v57_v37, %v566_v26  ;;  %v85_v48 = vsel %vm71_vm0, %v67_v40, 0.0 }
  0x7d   :  { %v72_v49 = vsel %vm71_vm0, %v63_v42, 0.0 }
  0x7e   :  { %v75_v56 = vsel %vm71_vm0, %v65_v46, 0.0 }
  0x7f   :  { %v48_v33 = vpop.xlane.xlu1 %47 }
  0x80   :  { %v60_v34 = vmul.f32 0.00390625, %v48_v33  ;;  %v36_v35 = vpop.xlane.xlu0 %35 }
  0x81   :  { %v51_v36 = vpop.xlane.xlu2 %50  ;;  %v56_v38 = vmul.f32 0.00390625, %v36_v35 }
  0x82   :  { %v61_v39 = vmul.f32 0.00390625, %v51_v36  ;;  %v68_v41 = vmul.f32 %v60_v34, %v561_v25 }
  0x83   :  { %v64_v43 = vmul.f32 %v56_v38, %v561_v25 }
  0x84   :  { %v86_v44 = vsel %vm71_vm0, %v68_v41, 0.0  ;;  %v69_v45 = vmul.f32 %v61_v39, %v566_v26 }
  0x85   :  { %v73_v47 = vsel %vm71_vm0, %v64_v43, 0.0  ;;  %v87_v50 = vadd.f32 %v86_v44, %v85_v48 }
  0x86   :  { %v74_v52 = vadd.f32 %v73_v47, %v72_v49  ;;  %v88_v53 = vsel %vm71_vm0, %v69_v45, 0.0 }
  0x87   :  { %v54_v51 = vpop.xlane.xlu1 %53  ;;  %v89_v59 = vadd.f32 %v88_v53, %v87_v50 }
  0x88   :  { %v62_v54 = vmul.f32 0.00390625, %v54_v51  ;;  %v42_v55 = vpop.xlane.xlu0 %41  ;;  %v76_v62 = vadd.f32 %v75_v56, %v74_v52 }
  0x89   :  { %v58_v57 = vmul.f32 0.00390625, %v42_v55  ;;  %v100_v29 = vpop.permute.xlu2 %99 }
  0x8a   :  { %v70_v58 = vmul.f32 %v62_v54, %v573_v27 }
  0x8b   :  { %v66_v60 = vmul.f32 %v58_v57, %v573_v27 }
  0x8c   :  { %v90_v61 = vsel %vm71_vm0, %v70_v58, 0.0 }
  0x8d   :  { %v91_v63 = vadd.f32 %v90_v61, %v89_v59  ;;  %v77_v3 = vsel %vm71_vm0, %v66_v60, 0.0 }
  0x8e   :  { %v78_v7 = vadd.f32 %v77_v3, %v76_v62 }
  0x8f   :  { %v92_v8 = vrot.slane %v91_v63, 4 }
  0x90   :  { %v79_v15 = vrot.slane %v78_v7, 4 }
  0x91   :  { %v93_v16 = vadd.f32 %v92_v8, %v91_v63  ;;  %v116_v40 = vpop.permute.xlu2 %115  ;;  %v439_v8 = vmov 6  }
  0x92   :  { %v80_v17 = vadd.f32 %v79_v15, %v78_v7  ;;  %404 = vset.pattern.permute.xlu1 %v439_v8  ;;  %403 = vset.pattern.permute.xlu2 %v439_v8 }
  0x93   :  { %v94_v22 = vrot.slane %v93_v16, 2  ;;  %402 = vset.pattern.permute.xlu0 %v439_v8 }
  0x94   :  { %v81_v23 = vrot.slane %v80_v17, 2 }
  0x95   :  { %v95_v28 = vadd.f32 %v94_v22, %v93_v16 }
  0x96   :  { %v82_v30 = vadd.f32 %v81_v23, %v80_v17 }
  0x97   :  { %v96_v31 = vrot.slane %v95_v28, 1 }
  0x98   :  { %v83_v32 = vrot.slane %v82_v30, 1 }
  0x99   :  { %v97_v33 = vadd.f32 %v96_v31, %v95_v28 }
  0x9a   :  { %v84_v34 = vadd.f32 %v83_v32, %v82_v30 }
  0x9b   :  { %v103_v36 = vadd.f32 %v100_v29, %v97_v33  ;;  %v112_v37 = vpop.permute.xlu0 %111 }
  0x9c   :  { %v102_v35 = vadd.f32 %v100_v29, %v84_v34 }
  0x9d   :  { %v105_v41 = vmax.f32 %v103_v36, 0.0 }
  0x9e   :  { %v104_v38 = vmax.f32 %v102_v35, 0.0 }
  0x9f   :  { %v114_v39 = vpop.permute.xlu1 %113  ;;  %v107_v46 = vperm.slane %v105_v41, 0 }
  0xa0   :  { %v106_v42 = vperm.slane %v104_v38, 0 }
  0xa1   :  { %v127_v51 = vmul.f32 %v112_v37, %v107_v46  ;;  %v128_v52 = vmul.f32 %v114_v39, %v107_v46  ;;  %v129_v58 = vmul.f32 %v116_v40, %v107_v46 }
  0xa2   :  { %v123_v43 = vmul.f32 %v112_v37, %v106_v42  ;;  %v124_v44 = vmul.f32 %v114_v39, %v106_v42  ;;  %v125_v45 = vmul.f32 %v116_v40, %v106_v42 }
  0xa3   :  { %v118_v50 = vpop.permute.xlu0 %117  ;;  %v146_v54 = vsel %vm71_vm0, %v128_v52, 0.0  ;;  %v143_v55 = vsel %vm71_vm0, %v127_v51, 0.0  ;;  %v149_v60 = vsel %vm71_vm0, %v129_v58, 0.0 }
  0xa4   :  { %v137_v47 = vsel %vm71_vm0, %v125_v45, 0.0  ;;  %v134_v48 = vsel %vm71_vm0, %v124_v44, 0.0  ;;  %v131_v49 = vsel %vm71_vm0, %v123_v43, 0.0  ;;  %v126_v53 = vmul.f32 %v118_v50, %v106_v42 }
  0xa5   :  { %138 = vadd.xlane.f32.xlu0 %v137_v47  ;;  %135 = vadd.xlane.f32.xlu1 %v134_v48  ;;  %v130_v57 = vmul.f32 %v118_v50, %v107_v46 }
  0xa6   :  { %132 = vadd.xlane.f32.xlu2 %v131_v49  ;;  %v140_v56 = vsel %vm71_vm0, %v126_v53, 0.0 }
  0xa7   :  { %v152_v59 = vsel %vm71_vm0, %v130_v57, 0.0 }
  0xad   :  { %147 = vadd.xlane.f32.xlu0 %v146_v54  ;;  %144 = vadd.xlane.f32.xlu1 %v143_v55 }
  0xae   :  { %141 = vadd.xlane.f32.xlu2 %v140_v56 }
  0xb5   :  { %153 = vadd.xlane.f32.xlu1 %v152_v59 }
  0xb6   :  { %150 = vadd.xlane.f32.xlu2 %v149_v60 }
 0x118   :  { %v136_v61 = vpop.xlane.xlu1 %135  ;;  %v139_v62 = vpop.xlane.xlu0 %138 }
 0x119   :  { %v156_v63 = vadd.f32 %v136_v61, %v561_v25  ;;  %v133_v3 = vpop.xlane.xlu2 %132  ;;  %v157_v7 = vadd.f32 %v139_v62, %v566_v26 }
 0x11a   :  { %v155_v15 = vadd.f32 %v133_v3, %v554_v24 }
 0x11b   :  { %v392_v16 = vmul.f32 -1.442695, %v156_v63  ;;  %v393_v17 = vmul.f32 -1.442695, %v157_v7 }
 0x11c   :  { %v391_v22 = vmul.f32 -1.442695, %v155_v15 }
 0x11d   :  { %405 = vpow2.f32 %v392_v16 }
 0x11e   :  { %407 = vpow2.f32 %v391_v22 }
 0x11f   :  { %409 = vpow2.f32 %v393_v17 }
 0x120   :  { %v145_v23 = vpop.xlane.xlu1 %144  ;;  %v148_v28 = vpop.xlane.xlu0 %147 }
 0x121   :  { %v159_v29 = vadd.f32 %v145_v23, %v554_v24  ;;  %v142_v30 = vpop.xlane.xlu2 %141  ;;  %v160_v32 = vadd.f32 %v148_v28, %v561_v25 }
 0x122   :  { %v158_v31 = vadd.f32 %v142_v30, %v573_v27 }
 0x123   :  { %v406_v33 = vpop.eup %405  ;;  %v395_v34 = vmul.f32 -1.442695, %v159_v29  ;;  %v396_v41 = vmul.f32 -1.442695, %v160_v32 }
 0x124   :  { %v408_v35 = vpop.eup %407  ;;  %v188_v36 = vadd.f32 1.0, %v406_v33  ;;  %v394_v39 = vmul.f32 -1.442695, %v158_v31 }
 0x125   :  { %v410_v37 = vpop.eup %409  ;;  %v187_v38 = vadd.f32 1.0, %v408_v35  ;;  %411 = vpow2.f32 %v395_v34 }
 0x126   :  { %413 = vrcp.f32 %v188_v36  ;;  %v606_v40 = vadd.f32 1.0, %v410_v37  ;;  %v219_v44 = vand.u32 2147483647, %v188_v36  ;;  %vm215_vm1 = vweird.f32 %v188_v36 }
 0x127   :  { %415 = vrcp.f32 %v187_v38  ;;  %v204_v50 = vand.u32 2147483647, %v187_v38  ;;  %vm200_vm2 = vweird.f32 %v187_v38  ;;  %v206_v52 = vand.u32 2147483648, %v187_v38 }
 0x128   :  { %417 = vrcp.f32 %v606_v40  ;;  %v154_v24 = vpop.xlane.xlu1 %153  ;;  %vm614_vm3 = vcmp.eq.f32.partialorder %v219_v44, 8.507059e+37  ;;  %v221_v55 = vand.u32 2147483648, %v188_v36  ;;  %vm230_vm4 = vweird.f32 %v606_v40 }
 0x129   :  { %419 = vpow2.f32 %v394_v39  ;;  %v162_v42 = vadd.f32 %v154_v24, %v573_v27  ;;  %v151_v25 = vpop.xlane.xlu2 %150  ;;  %vm622_vm5 = vcmp.eq.f32.partialorder %v204_v50, 8.507059e+37  ;;  %v236_v63 = vand.u32 2147483648, %v606_v40 }
 0x12a   :  { %421 = vpow2.f32 %v396_v41  ;;  %v161_v43 = vadd.f32 %v151_v25, %v566_v26  ;;  %v234_v16 = vand.u32 2147483647, %v606_v40  ;;  %v207_v31 = vor.u32 1.1754944e-38, %v206_v52 }
 0x12b   :  { %v412_v45 = vpop.eup %411  ;;  %v398_v46 = vmul.f32 -1.442695, %v162_v42  ;;  %v222_v32 = vor.u32 1.1754944e-38, %v221_v55  ;;  %v237_v37 = vor.u32 1.1754944e-38, %v236_v63 }
 0x12c   :  { %v414_v47 = vpop.eup %413  ;;  %v611_v48 = vadd.f32 1.0, %v412_v45  ;;  %v397_v49 = vmul.f32 -1.442695, %v161_v43  ;;  %vm235_vm12 = vcmp.eq.f32.partialorder %v234_v16, 8.507059e+37 }
 0x12d   :  { %v416_v51 = vpop.eup %415  ;;  %423 = vpow2.f32 %v398_v46  ;;  %v211_v53 = vmul.f32 %v414_v47, %v188_v36  ;;  %vm216_vm6 = vweird.f32 %v414_v47 }
 0x12e   :  { %v418_v54 = vpop.eup %417  ;;  %425 = vrcp.f32 %v611_v48  ;;  %v196_v27 = vmul.f32 %v416_v51, %v187_v38  ;;  %vm201_vm7 = vweird.f32 %v416_v51  ;;  %vm217_vm9 = vmor %vm215_vm1, %vm216_vm6  ;;  %v264_v45 = vand.u32 2147483647, %v611_v48 }
 0x12f   :  { %v420_v56 = vpop.eup %419  ;;  %427 = vpow2.f32 %v397_v49  ;;  %v212_v57 = vsub.f32 1.0, %v211_v53  ;;  %v226_v58 = vmul.f32 %v418_v54, %v606_v40  ;;  %vm231_vm8 = vweird.f32 %v418_v54  ;;  %vm202_vm10 = vmor %vm200_vm2, %vm201_vm7 }
 0x130   :  { %v422_v59 = vpop.eup %421  ;;  %v620_v60 = vadd.f32 1.0, %v420_v56  ;;  %v197_v61 = vsub.f32 1.0, %v196_v27  ;;  %vm232_vm11 = vmor %vm230_vm4, %vm231_vm8  ;;  %v266_v46 = vand.u32 2147483648, %v611_v48  ;;  %vm260_vm14 = vweird.f32 %v611_v48 }
 0x131   :  { %v627_v3 = vadd.f32 1.0, %v422_v59  ;;  %v213_v7 = vmul.f32 %v414_v47, %v212_v57  ;;  %v227_v8 = vsub.f32 1.0, %v226_v58  ;;  %vm265_vm0 = vcmp.eq.f32.partialorder %v264_v45, 8.507059e+37 }
 0x132   :  { %429 = vrcp.f32 %v620_v60  ;;  %v198_v15 = vmul.f32 %v416_v51, %v197_v61  ;;  %v249_v50 = vand.u32 2147483647, %v620_v60  ;;  %v251_v52 = vand.u32 2147483648, %v620_v60 }
 0x133   :  { %v424_v17 = vpop.eup %423  ;;  %431 = vrcp.f32 %v627_v3  ;;  %v214_v22 = vadd.f32 %v414_v47, %v213_v7  ;;  %v228_v23 = vmul.f32 %v418_v54, %v227_v8  ;;  %v267_v26 = vor.u32 1.1754944e-38, %v266_v46 }
 0x134   :  { %v426_v28 = vpop.eup %425  ;;  %v632_v29 = vadd.f32 1.0, %v424_v17  ;;  %v199_v30 = vadd.f32 %v416_v51, %v198_v15  ;;  %vm245_vm2 = vweird.f32 %v620_v60  ;;  %v252_v63 = vor.u32 1.1754944e-38, %v251_v52 }
 0x135   :  { %v428_v33 = vpop.eup %427  ;;  %v218_v34 = vsel %vm217_vm9, %v414_v47, %v214_v22  ;;  %v229_v35 = vadd.f32 %v418_v54, %v228_v23  ;;  %v256_v39 = vmul.f32 %v426_v28, %v611_v48  ;;  %vm261_vm13 = vweird.f32 %v426_v28 }
 0x136   :  { %433 = vrcp.f32 %v632_v29  ;;  %v639_v41 = vadd.f32 1.0, %v428_v33  ;;  %v203_v24 = vsel %vm202_vm10, %v416_v51, %v199_v30  ;;  %v223_v42 = vsel %vm614_vm3, %v222_v32, %v218_v34  ;;  %vm262_vm15 = vmor %vm260_vm14, %vm261_vm13 }
 0x137   :  { %v208_v36 = vsel %vm622_vm5, %v207_v31, %v203_v24  ;;  %322 = vperm.xlu2 %403, %v223_v42   ;;  %v233_v38 = vsel %vm232_vm11, %v418_v54, %v229_v35  ;;  %v257_v25 = vsub.f32 1.0, %v256_v39  ;;  %vm661_vm3 = vcmp.eq.f32.partialorder %v249_v50, 8.507059e+37 }
 0x138   :  { %v430_v43 = vpop.eup %429  ;;  %435 = vrcp.f32 %v639_v41  ;;  %317 = vperm.xlu0 %402, %v208_v36   ;;  %v238_v44 = vsel %vm235_vm12, %v237_v37, %v233_v38  ;;  %vm305_vm5 = vweird.f32 %v632_v29  ;;  %v309_v15 = vand.u32 2147483647, %v632_v29 }
 0x139   :  { %v651_v47 = vpop.eup %431  ;;  %327 = vperm.xlu1 %404, %v238_v44   ;;  %v241_v40 = vmul.f32 %v430_v43, %v620_v60  ;;  %v258_v49 = vmul.f32 %v426_v28, %v257_v25  ;;  %vm246_vm1 = vweird.f32 %v430_v43  ;;  %v311_v16 = vand.u32 2147483648, %v632_v29 }
 0x13a   :  { %v271_v54 = vmul.f32 %v651_v47, %v627_v3  ;;  %vm247_vm4 = vmor %vm245_vm2, %vm246_vm1  ;;  %v294_v30 = vand.u32 2147483647, %v639_v41  ;;  %v296_v31 = vand.u32 2147483648, %v639_v41  ;;  %vm276_vm7 = vweird.f32 %v651_v47 }
 0x13b   :  { %v242_v51 = vsub.f32 1.0, %v241_v40  ;;  %v259_v53 = vadd.f32 %v426_v28, %v258_v49  ;;  %v312_v35 = vor.u32 1.1754944e-38, %v311_v16  ;;  %vm290_vm10 = vweird.f32 %v639_v41 }
 0x13c   :  { %v434_v27 = vpop.eup %433  ;;  %v272_v61 = vsub.f32 1.0, %v271_v54  ;;  %vm275_vm11 = vweird.f32 %v627_v3  ;;  %v281_v37 = vand.u32 2147483648, %v627_v3  ;;  %vm310_vm12 = vcmp.eq.f32.partialorder %v309_v15, 8.507059e+37 }
 0x13d   :  { %v243_v55 = vmul.f32 %v430_v43, %v242_v51  ;;  %v263_v56 = vsel %vm262_vm15, %v426_v28, %v259_v53  ;;  %v301_v57 = vmul.f32 %v434_v27, %v632_v29  ;;  %vm306_vm6 = vweird.f32 %v434_v27  ;;  %vm277_vm13 = vmor %vm275_vm11, %vm276_vm7 }
 0x13e   :  { %v436_v58 = vpop.eup %435  ;;  %v268_v59 = vsel %vm265_vm0, %v267_v26, %v263_v56  ;;  %v273_v60 = vmul.f32 %v651_v47, %v272_v61  ;;  %vm307_vm9 = vmor %vm305_vm5, %vm306_vm6  ;;  %v279_v42 = vand.u32 2147483647, %v627_v3  ;;  %v297_v38 = vor.u32 1.1754944e-38, %v296_v31 }
 0x13f   :  { %v244_v62 = vadd.f32 %v430_v43, %v243_v55  ;;  %v302_v7 = vsub.f32 1.0, %v301_v57  ;;  %v286_v8 = vmul.f32 %v436_v58, %v639_v41  ;;  %vm291_vm8 = vweird.f32 %v436_v58 }
 0x140   :  { %v274_v34 = vadd.f32 %v651_v47, %v273_v60  ;;  %vm292_vm14 = vmor %vm290_vm10, %vm291_vm8  ;;  %vm295_vm15 = vcmp.eq.f32.partialorder %v294_v30, 8.507059e+37  ;;  %v282_v41 = vor.u32 1.1754944e-38, %v281_v37  ;;  %vm280_vm0 = vcmp.eq.f32.partialorder %v279_v42, 8.507059e+37 }
 0x141   :  { %v248_v17 = vsel %vm247_vm4, %v430_v43, %v244_v62  ;;  %337 = vperm.xlu1 %404, %v268_v59   ;;  %v303_v22 = vmul.f32 %v434_v27, %v302_v7  ;;  %v287_v23 = vsub.f32 1.0, %v286_v8 }
 0x142   :  { %v253_v28 = vsel %vm661_vm3, %v252_v63, %v248_v17  ;;  %v278_v29 = vsel %vm277_vm13, %v651_v47, %v274_v34 }
 0x143   :  { %332 = vperm.xlu2 %403, %v253_v28   ;;  %v304_v32 = vadd.f32 %v434_v27, %v303_v22  ;;  %v288_v33 = vmul.f32 %v436_v58, %v287_v23  ;;  %v283_v44 = vsel %vm280_vm0, %v282_v41, %v278_v29 }
 0x145   :  { %v308_v39 = vsel %vm307_vm9, %v434_v27, %v304_v32  ;;  %v289_v24 = vadd.f32 %v436_v58, %v288_v33 }
 0x146   :  { %v313_v36 = vsel %vm310_vm12, %v312_v35, %v308_v39 }
 0x147   :  { %352 = vperm.xlu0 %402, %v313_v36   ;;  %v293_v25 = vsel %vm292_vm14, %v436_v58, %v289_v24 }
 0x148   :  { %v298_v43 = vsel %vm295_vm15, %v297_v38, %v293_v25 }
 0x149   :  { %347 = vperm.xlu1 %404, %v298_v43  }
 0x14b   :  { %342 = vperm.xlu2 %403, %v283_v44  }
 0x191   :  { %v323_v45 = vpop.permute.xlu2 %322 }
 0x192   :  { %v357_v46 = vmul.f32 %v323_v45, %v504_v11  ;;  %v358_v40 = vmul.f32 %v323_v45, %v509_v12 }
 0x194   :  { %373 = vst [vmem:[%s749_s2 + $0x10] sm:$0xff] %v357_v46 }
 0x195   :  { %374 = vst [vmem:[%s749_s2 + $0x18] sm:$0xff] %v358_v40 }
 0x19d   :  { %v333_v3 = vpop.permute.xlu2 %332 }
 0x19e   :  { %v361_v47 = vmul.f32 %v333_v3, %v540_v20  ;;  %v362_v49 = vmul.f32 %v333_v3, %v545_v21 }
 0x1a0   :  { %377 = vst [vmem:[%s749_s2 + $0x30] sm:$0xff] %v361_v47 }
 0x1a1   :  { %378 = vst [vmem:[%s749_s2 + $0x38] sm:$0xff] %v362_v49 }
 0x1a5   :  { %v343_v11 = vpop.permute.xlu2 %342 }
 0x1a6   :  { %v365_v12 = vmul.f32 %v343_v11, %v494_v9  ;;  %v366_v50 = vmul.f32 %v343_v11, %v499_v10 }
 0x1a8   :  { %381 = vst [vmem:[%s749_s2 + $0x50] sm:$0xff] %v365_v12 }
 0x1a9   :  { %382 = vst [vmem:[%s749_s2 + $0x58] sm:$0xff] %v366_v50 }
 0x1aa   :  { %v318_v20 = vpop.permute.xlu0 %317 }
 0x1ab   :  { %v328_v21 = vpop.permute.xlu1 %327  ;;  %v355_v51 = vmul.f32 %v318_v20, %v468_v2  ;;  %v356_v9 = vmul.f32 %v318_v20, %v475_v4 }
 0x1ac   :  { %v359_v52 = vmul.f32 %v328_v21, %v480_v5  ;;  %v360_v53 = vmul.f32 %v328_v21, %v485_v6 }
 0x1ad   :  { %371 = vst [vmem:[%s749_s2] sm:$0xff] %v355_v51 }
 0x1ae   :  { %375 = vst [vmem:[%s749_s2 + $0x20] sm:$0xff] %v359_v52 }
 0x1af   :  { %376 = vst [vmem:[%s749_s2 + $0x28] sm:$0xff] %v360_v53 }
 0x1b0   :  { %372 = vst [vmem:[%s749_s2 + $0x8] sm:$0xff] %v356_v9 }
 0x1b3   :  { %v338_v2 = vpop.permute.xlu1 %337 }
 0x1b4   :  { %v363_v5 = vmul.f32 %v338_v2, %v458_v0  ;;  %v364_v4 = vmul.f32 %v338_v2, %v463_v1 }
 0x1b6   :  { %379 = vst [vmem:[%s749_s2 + $0x40] sm:$0xff] %v363_v5 }
 0x1b7   :  { %380 = vst [vmem:[%s749_s2 + $0x48] sm:$0xff] %v364_v4 }
 0x1b9   :  { %v353_v6 = vpop.permute.xlu0 %352 }
 0x1ba   :  { %v369_v10 = vmul.f32 %v353_v6, %v530_v18  ;;  %v370_v54 = vmul.f32 %v353_v6, %v535_v19 }
 0x1bb   :  { %v348_v27 = vpop.permute.xlu1 %347 }
 0x1bc   :  { %v367_v26 = vmul.f32 %v348_v27, %v514_v13  ;;  %v368_v0 = vmul.f32 %v348_v27, %v519_v14  ;;  %385 = vst [vmem:[%s749_s2 + $0x70] sm:$0xff] %v369_v10 }
 0x1bd   :  { %386 = vst [vmem:[%s749_s2 + $0x78] sm:$0xff] %v370_v54 }
 0x1be   :  { %383 = vst [vmem:[%s749_s2 + $0x60] sm:$0xff] %v367_v26 }
 0x1bf   :  { %384 = vst [vmem:[%s749_s2 + $0x68] sm:$0xff] %v368_v0 }

</bundles_post_ra>
